<compile_context>
chip_gen: v7x
topology: tpu7x:2x2x1
jax: 0.10.0
libtpu: 0.0.40
codegen_flags: <defaults>
</compile_context>

<pallas_src>
import numpy as np
import jax
import jax.numpy as jnp
from jax.experimental import pallas as pl
from jax.experimental.pallas import tpu as pltpu

_BN_EPS = 1e-5
_CPAD = 8                         # channel padding multiple (f32 sublane)
_LANE_TARGET = 512                # aim for >= this many lanes per grid step
_VMEM_LIMIT = 32 * 1024 * 1024    # explicit scoped-VMEM ceiling (v7x-safe)


def _rup(x, m):
    return (x + m - 1) // m * m


class _Geom:
    """Geometry of one resolution level of the padded-flat layout."""

    def __init__(self, n, h, w):
        self.N, self.H, self.W = n, h, w
        self.Hp, self.Wp = h + 2, w + 2
        self.Lp = _rup(self.Hp * self.Wp, 128)   # lane-padded plane length
        self.L = n * self.Lp                     # batch folded into lanes
        # Interior taps must never wrap within an image's Lp segment:
        # max |tap offset| = Wp+1, interior flat indices in [Wp+1, Hp*Wp-Wp-2].
        assert self.Hp * self.Wp <= self.Lp
        assert self.Wp + 1 <= self.Hp * self.Wp - self.Wp - 2


def _images_per_step(g):
    """Images folded into one grid step (>= _LANE_TARGET lanes when possible)."""
    ips = max(1, min(g.N, _LANE_TARGET // g.Lp))
    while g.N % ips:
        ips -= 1
    return ips


def _res_spec(shape):
    """Resident (grid-invariant) full-array BlockSpec."""
    if len(shape) == 2:
        return pl.BlockSpec(shape, lambda i: (0, 0))
    return pl.BlockSpec(shape, lambda i: (0, 0, 0))


# ----------------------------------------------------------------------------
# Eager capability probes (run once, tiny kernels)
# ----------------------------------------------------------------------------
_ROLL_SIGN = None
_TAP_BF16 = None


def _roll_matches_jnp():
    """+1 if pltpu.roll(x, s) == jnp.roll(x, s) (contents move forward), -1 else."""
    global _ROLL_SIGN
    if _ROLL_SIGN is None:
        def k(x_ref, o_ref):
            o_ref[...] = pltpu.roll(x_ref[...], 1, 1)
        x = jnp.tile(jnp.arange(128, dtype=jnp.float32)[None, :], (8, 1))
        y = pl.pallas_call(
            k,
            out_shape=jax.ShapeDtypeStruct((8, 128), jnp.float32),
            grid=(1,),
            in_specs=[_res_spec((8, 128))],
            out_specs=_res_spec((8, 128)),
        )(x)
        _ROLL_SIGN = 1 if int(np.asarray(y)[0, 0]) == 127 else -1
    return _ROLL_SIGN


def _bf16_tap_path_ok():
    """Probe whether bf16 roll + sub-tile (8-row) bf16 concat lowers on this
    Mosaic version.  If not, the tap build falls back to the aligned f32 path."""
    global _TAP_BF16
    if _TAP_BF16 is None:
        def k(x_ref, w_ref, o_ref):
            xb = x_ref[...].astype(jnp.bfloat16)
            t = jnp.concatenate(
                [xb, pltpu.roll(xb, 1, 1), pltpu.roll(xb, 2, 1)], axis=0)
            o_ref[...] = jnp.dot(w_ref[...], t,
                                 preferred_element_type=jnp.float32)
        try:
            x = jnp.ones((8, 256), jnp.float32)
            w = jnp.ones((8, 24), jnp.bfloat16)
            out = pl.pallas_call(
                k,
                out_shape=jax.ShapeDtypeStruct((8, 256), jnp.float32),
                grid=(1,),
                in_specs=[_res_spec((8, 256)), _res_spec((8, 24))],
                out_specs=_res_spec((8, 256)),
            )(x, w)
            jax.block_until_ready(out)
            _TAP_BF16 = True
        except Exception:      # lowering not supported -> aligned f32 fallback
            _TAP_BF16 = False
    return _TAP_BF16


# ----------------------------------------------------------------------------
# Static "tap plans": list of (source_index, roll_shift) per conv tap.
# Shifts are modulo the BLOCK lane extent (per-step tile), per review.
# ----------------------------------------------------------------------------
def _shift_for(d, lane):
    """pltpu.roll shift so that output column q reads source column (q + d)."""
    return (-_roll_matches_jnp() * d) % lane


def _conv_plan(g, lane):
    # stride-1 'same' conv: tap (kh, kw) reads flat offset (kh-1)*Wp + (kw-1)
    return [(0, _shift_for((kh - 1) * g.Wp + (kw - 1), lane))
            for kh in range(3) for kw in range(3)]


# kh -> (row parity plane, row offset within the plane) for the stride-2 conv
_DOWN_RK = {0: (1, -1), 1: (0, 0), 2: (1, 0)}


def _down_plan(g_out, lane):
    # stride-2 conv reads x[2io+kh-1, 2jo+kw-1] = parity plane (rh,rw)[io+ah, jo+aw]
    plan = []
    for kh in range(3):
        rh, ah = _DOWN_RK[kh]
        for kw in range(3):
            rw, aw = _DOWN_RK[kw]
            plan.append((rh * 2 + rw, _shift_for(ah * g_out.Wp + aw, lane)))
    return plan


def _up_plan(g_c, lane):
    # transposed-conv phases read x[i+di, j+dj], (di, dj) in {0,1}^2
    return [(0, _shift_for(di * g_c.Wp + dj, lane))
            for di in range(2) for dj in range(2)]


# ----------------------------------------------------------------------------
# Interior mask: 1 at real pixel positions, 0 on padding ring / lane tail.
# Built once per (geometry, images-per-step) and reused (review item: dedupe).
# ----------------------------------------------------------------------------
_MASKS = {}


def _interior_mask(g, ips):
    key = (g.H, g.W, ips)
    if key not in _MASKS:
        m = np.zeros((g.Hp, g.Wp), np.float32)
        m[1:g.H + 1, 1:g.W + 1] = 1.0
        flat = np.zeros((g.Lp,), np.float32)
        flat[: g.Hp * g.Wp] = m.reshape(-1)
        _MASKS[key] = jnp.asarray(np.tile(flat, ips)[None, :])
    return _MASKS[key]


# ----------------------------------------------------------------------------
# Pallas kernels
# ----------------------------------------------------------------------------
def _build_taps(srcs, plan, tap_bf16):
    """srcs: list of (C, lanes) f32 values; plan: static [(src, shift)].
    Returns the (K, lanes) bf16 tap matrix.  If tap_bf16, sources are cast once
    and rolls + concat run on bf16 (half XLU/copy traffic); otherwise the build
    stays f32 (always tile-aligned) and is cast once at the end."""
    if tap_bf16:
        srcs = [s.astype(jnp.bfloat16) for s in srcs]
    parts = []
    for src, s in plan:
        v = srcs[src]
        parts.append(v if s == 0 else pltpu.roll(v, s, 1))
    t = jnp.concatenate(parts, axis=0)
    return t if tap_bf16 else t.astype(jnp.bfloat16)


def _make_block_kernel(plan, has_pre, tap_bf16):
    """Fused BasicBlock: (x [+ pre]) -> conv -> BN -> ReLU -> conv(shared W)
    -> BN -> +input -> ReLU (Dropout2d = eval identity), one kernel."""
    def kernel(*refs):
        if has_pre:
            x_ref, pre_ref, w_ref, aff_ref, mask_ref, o_ref = refs
        else:
            x_ref, w_ref, aff_ref, mask_ref, o_ref = refs
        x = x_ref[...]
        if has_pre:
            x = x + pre_ref[...]          # ladder skip add fused into the block
        w = w_ref[...]                    # (Cout_p, 9*Cin_p) bf16, resident
        m = mask_ref[...]                 # (1, lanes)
        # conv1 -> bn1 -> relu
        t1 = _build_taps([x], plan, tap_bf16)
        y = jnp.dot(w, t1, preferred_element_type=jnp.float32)
        y = jnp.maximum(y * aff_ref[0] + aff_ref[1], 0.0) * m
        # conv1 again (shared weights) -> bn2 -> + block input -> relu
        t2 = _build_taps([y], plan, tap_bf16)
        z = jnp.dot(w, t2, preferred_element_type=jnp.float32)
        o_ref[...] = jnp.maximum(z * aff_ref[2] + aff_ref[3] + x, 0.0) * m
    return kernel


def _make_down_kernel(plan, tap_bf16):
    """Conv2d(k=3, s=2, p=1) + bias + ReLU from 4 parity planes (only the
    strided outputs are computed): one matmul."""
    def kernel(x4_ref, w_ref, b_ref, mask_ref, o_ref):
        x4 = x4_ref[...]                  # (4, Cin_p, lanes)
        t = _build_taps([x4[0], x4[1], x4[2], x4[3]], plan, tap_bf16)
        y = jnp.dot(w_ref[...], t, preferred_element_type=jnp.float32)
        o_ref[...] = jnp.maximum(y + b_ref[...], 0.0) * mask_ref[...]
    return kernel


def _make_up_kernel(plan, tap_bf16):
    """ConvTranspose2d(k=3, s=2, p=1, op=1) + bias via 4-phase decomposition:
    one matmul producing all four output parities."""
    def kernel(x_ref, w_ref, b_ref, mask_ref, o_ref):
        t = _build_taps([x_ref[...]], plan, tap_bf16)
        y = jnp.dot(w_ref[...], t, preferred_element_type=jnp.float32)
        o_ref[...] = (y + b_ref[...]) * mask_ref[...]
    return kernel


# ----------------------------------------------------------------------------
# pallas_call wrappers (batch-fold lane tiling, resident weights, parallel grid)
# ----------------------------------------------------------------------------
def _pcall(kernel, args, in_specs, out_rows, lane, grid, l_total):
    return pl.pallas_call(
        kernel,
        out_shape=jax.ShapeDtypeStruct((out_rows, l_total), jnp.float32),
        grid=grid,
        in_specs=in_specs,
        out_specs=pl.BlockSpec((out_rows, lane), lambda i: (0, i)),
        compiler_params=pltpu.CompilerParams(
            dimension_semantics=("parallel",),     # megacore sharding on v7x
            vmem_limit_bytes=_VMEM_LIMIT),
    )(*args)


def basic_block(x, p, g, pre=None):
    cp, l_total = x.shape
    ips = _images_per_step(g)
    lane = ips * g.Lp
    grid = (l_total // lane,)
    mask = _interior_mask(g, ips)
    xspec = pl.BlockSpec((cp, lane), lambda i: (0, i))
    args = [x] + ([pre] if pre is not None else []) + [p["w"], p["aff"], mask]
    in_specs = ([xspec] * (2 if pre is not None else 1)
                + [_res_spec(p["w"].shape), _res_spec(p["aff"].shape),
                   _res_spec(mask.shape)])
    kern = _make_block_kernel(_conv_plan(g, lane), pre is not None,
                              _bf16_tap_path_ok())
    return _pcall(kern, args, in_specs, cp, lane, grid, l_total)


def down_conv(planes4, p, g_out):
    cop = p["w"].shape[0]
    _, cip, l_total = planes4.shape
    ips = _images_per_step(g_out)
    lane = ips * g_out.Lp
    grid = (l_total // lane,)
    mask = _interior_mask(g_out, ips)
    args = [planes4, p["w"], p["b"], mask]
    in_specs = [pl.BlockSpec((4, cip, lane), lambda i: (0, 0, i)),
                _res_spec(p["w"].shape), _res_spec(p["b"].shape),
                _res_spec(mask.shape)]
    kern = _make_down_kernel(_down_plan(g_out, lane), _bf16_tap_path_ok())
    return _pcall(kern, args, in_specs, cop, lane, grid, l_total)


def up_conv(x, p, g_c):
    rows = p["w"].shape[0]                 # 4 * Cout_p
    cip, l_total = x.shape
    ips = _images_per_step(g_c)
    lane = ips * g_c.Lp
    grid = (l_total // lane,)
    mask = _interior_mask(g_c, ips)
    args = [x, p["w"], p["b"], mask]
    in_specs = [pl.BlockSpec((cip, lane), lambda i: (0, i)),
                _res_spec(p["w"].shape), _res_spec(p["b"].shape),
                _res_spec(mask.shape)]
    kern = _make_up_kernel(_up_plan(g_c, lane), _bf16_tap_path_ok())
    return _pcall(kern, args, in_specs, rows, lane, grid, l_total)


# ----------------------------------------------------------------------------
# Layout glue (cheap XLA relayout of small tensors)
# TODO(synk): parity split / phase interleave stay in XLA (lane-stride gather
# has no cheap in-kernel Mosaic expression); see review items #5/#6.
# ----------------------------------------------------------------------------
def _to_pf(x, cp, g):
    """NCHW -> padded-flat channel-major (Cp, N*Lp)."""
    n, c, h, w = x.shape
    x = jnp.transpose(x, (1, 0, 2, 3)).astype(jnp.float32)
    x = jnp.pad(x, ((0, cp - c), (0, 0), (1, 1), (1, 1)))
    x = x.reshape(cp, n, g.Hp * g.Wp)
    x = jnp.pad(x, ((0, 0), (0, 0), (0, g.Lp - g.Hp * g.Wp)))
    return x.reshape(cp, g.L)


def _from_pf(xf, g, c_real):
    cp = xf.shape[0]
    x = xf.reshape(cp, g.N, g.Lp)[:, :, : g.Hp * g.Wp]
    x = x.reshape(cp, g.N, g.Hp, g.Wp)[:c_real, :, 1:g.H + 1, 1:g.W + 1]
    return jnp.transpose(x, (1, 0, 2, 3))


def _split_parity(xf, g_in, g_out):
    """(C, N*Lp) -> (4, C, N*Lp_half): plane[rh*2+rw] = x[2i+rh, 2j+rw]."""
    c = xf.shape[0]
    x = xf.reshape(c, g_in.N, g_in.Lp)[:, :, : g_in.Hp * g_in.Wp]
    x = x.reshape(c, g_in.N, g_in.Hp, g_in.Wp)[:, :, 1:g_in.H + 1, 1:g_in.W + 1]
    x = x.reshape(c, g_in.N, g_out.H, 2, g_out.W, 2)
    x = jnp.transpose(x, (3, 5, 0, 1, 2, 4))
    x = x.reshape(4 * c, g_in.N, g_out.H, g_out.W)
    x = jnp.pad(x, ((0, 0), (0, 0), (1, 1), (1, 1)))
    x = x.reshape(4 * c, g_in.N, g_out.Hp * g_out.Wp)
    x = jnp.pad(x, ((0, 0), (0, 0), (0, g_out.Lp - g_out.Hp * g_out.Wp)))
    return x.reshape(4, c, g_out.L)


def _interleave_phases(ph, g_c, g_f, cp):
    """(4*cp, N*Lp_coarse) phase outputs -> (cp, N*Lp_fine) padded-flat."""
    x = ph.reshape(4 * cp, g_c.N, g_c.Lp)[:, :, : g_c.Hp * g_c.Wp]
    x = x.reshape(4 * cp, g_c.N, g_c.Hp, g_c.Wp)[:, :, 1:g_c.H + 1, 1:g_c.W + 1]
    x = x.reshape(2, 2, cp, g_c.N, g_c.H, g_c.W)
    x = jnp.transpose(x, (2, 3, 4, 0, 5, 1)).reshape(cp, g_c.N, g_f.H, g_f.W)
    x = jnp.pad(x, ((0, 0), (0, 0), (1, 1), (1, 1)))
    x = x.reshape(cp, g_c.N, g_f.Hp * g_f.Wp)
    x = jnp.pad(x, ((0, 0), (0, 0), (0, g_f.Lp - g_f.Hp * g_f.Wp)))
    return x.reshape(cp, g_f.L)


# ----------------------------------------------------------------------------
# Module forward (LadderBlock / Final_LadderBlock)
# ----------------------------------------------------------------------------
def final_ladder_block_fwd(xs, P):
    """xs: list of NCHW features, xs[-1] finest (planes ch), xs[-2] half res
    (2*planes ch), ...  Returns LadderBlock's up_out[-1] as NCHW float32."""
    layers = len(P["down_module"]) + 1
    n, planes, h, w = xs[-1].shape
    geoms = [_Geom(n, h >> l, w >> l) for l in range(layers)]
    cps = [_rup(planes * 2 ** l, _CPAD) for l in range(layers)]

    x0 = _to_pf(xs[-1], cps[0], geoms[0])
    skips = [x0] + [_to_pf(xs[-1 - l], cps[l], geoms[l])
                    for l in range(1, layers - 1)]

    out = basic_block(x0, P["inconv"], geoms[0])
    down_out = []
    for i in range(layers - 1):
        # (out + x[-i-1]) -> BasicBlock, fused into a single kernel
        out = basic_block(out, P["down_module"][i], geoms[i], pre=skips[i])
        down_out.append(out)
        planes4 = _split_parity(out, geoms[i], geoms[i + 1])
        out = down_conv(planes4, P["down_conv"][i], geoms[i + 1])  # s2 conv+ReLU

    out = basic_block(out, P["bottom"], geoms[layers - 1])

    for j in range(layers - 1):
        lc, lf = layers - 1 - j, layers - 2 - j
        ph = up_conv(out, P["up_conv"][j], geoms[lc])              # 4-phase convT
        fine = _interleave_phases(ph, geoms[lc], geoms[lf], cps[lf])
        out = basic_block(fine, P["up_dense"][j], geoms[lf],
                          pre=down_out[layers - j - 2])            # +down_out fused
    return _from_pf(out, geoms[0], planes)


# ----------------------------------------------------------------------------
# Parameter preparation (deterministic init, eval-mode BN folded)
# ----------------------------------------------------------------------------
def _fold_bn(bias, bn, cp):
    gamma, beta, mean, var = bn
    c = gamma.shape[0]
    s = gamma / jnp.sqrt(var + _BN_EPS)
    sh = (bias - mean) * s + beta
    out = jnp.zeros((2, cp), jnp.float32)
    return out.at[0, :c].set(s).at[1, :c].set(sh)


def _prep_conv_w(w_hwio, cin_p, cout_p):
    """(3,3,cin,cout) -> (cout_p, 9*cin_p) bf16, tap index k = kh*3 + kw."""
    cin, cout = w_hwio.shape[2], w_hwio.shape[3]
    w = jnp.zeros((cout_p, 9, cin_p), jnp.float32)
    w = w.at[:cout, :, :cin].set(
        jnp.transpose(w_hwio.reshape(9, cin, cout), (2, 0, 1)))
    return w.reshape(cout_p, 9 * cin_p).astype(jnp.bfloat16)


def _prep_upconv_w(w_t, cin_p, cout_p):
    """PyTorch ConvTranspose2d weight (cin, cout, 3, 3) -> 4-phase matrix
    (4*cout_p, 4*cin_p) bf16.  Tap order (di,dj)=(0,0),(0,1),(1,0),(1,1);
    phase order (pi,pj)=(0,0),(0,1),(1,0),(1,1)."""
    cin, cout = w_t.shape[0], w_t.shape[1]
    v = jnp.transpose(w_t, (1, 0, 2, 3))           # (cout, cin, kh, kw)
    wu = jnp.zeros((4 * cout_p, 4 * cin_p), jnp.float32)

    def put(wu, ph, tap, kh, kw):
        return wu.at[ph * cout_p:ph * cout_p + cout,
                     tap * cin_p:tap * cin_p + cin].set(v[:, :, kh, kw])

    wu = put(wu, 0, 0, 1, 1)                                  # (even, even)
    wu = put(wu, 1, 0, 1, 2); wu = put(wu, 1, 1, 1, 0)        # (even, odd)
    wu = put(wu, 2, 0, 2, 1); wu = put(wu, 2, 2, 0, 1)        # (odd, even)
    wu = put(wu, 3, 0, 2, 2); wu = put(wu, 3, 1, 2, 0)        # (odd, odd)
    wu = put(wu, 3, 2, 0, 2); wu = put(wu, 3, 3, 0, 0)
    return wu.astype(jnp.bfloat16)


def _pad_bias(b, cout_p, reps):
    cout = b.shape[0]
    bb = jnp.zeros((reps, cout_p), jnp.float32).at[:, :cout].set(b)
    return bb.reshape(reps * cout_p, 1)


def _init_params(planes, layers, seed=0):
    keys = iter(jax.random.split(jax.random.PRNGKey(seed), 512))

    def nrm(shape, s=1.0):
        return s * jax.random.normal(next(keys), shape, jnp.float32)

    def init_bn(c):
        gamma = 1.0 + 0.1 * nrm((c,))
        beta = 0.1 * nrm((c,))
        mean = 0.1 * nrm((c,))
        var = 1.0 + 0.5 * jax.random.uniform(next(keys), (c,), jnp.float32)
        return gamma, beta, mean, var

    def init_block(c):
        cp = _rup(c, _CPAD)
        w = nrm((3, 3, c, c), 1.0 / np.sqrt(9.0 * c))
        b = 0.1 * nrm((c,))
        aff = jnp.concatenate([_fold_bn(b, init_bn(c), cp),
                               _fold_bn(b, init_bn(c), cp)], axis=0)
        return dict(w=_prep_conv_w(w, cp, cp), aff=aff.reshape(4, cp, 1))

    def init_down(cin, cout):
        cip, cop = _rup(cin, _CPAD), _rup(cout, _CPAD)
        w = nrm((3, 3, cin, cout), 1.0 / np.sqrt(9.0 * cin))
        b = 0.1 * nrm((cout,))
        return dict(w=_prep_conv_w(w, cip, cop), b=_pad_bias(b, cop, 1))

    def init_up(cin, cout):
        cip, cop = _rup(cin, _CPAD), _rup(cout, _CPAD)
        w = nrm((cin, cout, 3, 3), 1.0 / np.sqrt(9.0 * cin))
        b = 0.1 * nrm((cout,))
        return dict(w=_prep_upconv_w(w, cip, cop), b=_pad_bias(b, cop, 4))

    return dict(
        inconv=init_block(planes),
        down_module=[init_block(planes * 2 ** i) for i in range(layers - 1)],
        down_conv=[init_down(planes * 2 ** i, planes * 2 ** (i + 1))
                   for i in range(layers - 1)],
        bottom=init_block(planes * 2 ** (layers - 1)),
        up_conv=[init_up(planes * 2 ** (layers - 1 - i),
                         planes * 2 ** (layers - 2 - i))
                 for i in range(layers - 1)],
        up_dense=[init_block(planes * 2 ** (layers - 2 - i))
                  for i in range(layers - 1)],
    )


# ----------------------------------------------------------------------------
if __name__ == "__main__":
    PLANES, LAYERS = 4, 3
    N, H, W = 2, 16, 16

    _roll_matches_jnp()                 # resolve roll direction once (eagerly)
    _bf16_tap_path_ok()                 # resolve bf16 tap-build support once
    params = _init_params(PLANES, LAYERS, seed=0)

    kx1, kx2 = jax.random.split(jax.random.PRNGKey(0), 2)
    # NCHW feature-pyramid inputs, xs[-1] = finest scale (like the PyTorch module)
    x_fine = jax.random.normal(kx1, (N, PLANES, H, W), jnp.float32)
    x_half = jax.random.normal(kx2, (N, 2 * PLANES, H // 2, W // 2), jnp.float32)
    xs = [x_half, x_fine]

    fwd = jax.jit(final_ladder_block_fwd)
    out = jax.block_until_ready(fwd(xs, params))

    assert out.shape == (N, PLANES, H, W), out.shape
    assert out.dtype == jnp.float32
    assert bool(jnp.all(jnp.isfinite(out)))
    print("KERNEL_OK")
</pallas_src>

<mosaic_0001>
module attributes {stable_mosaic.version = 11 : i64} {
  func.func @k(%arg0: i32, %arg1: memref<8x128xf32, #tpu.memory_space<vmem>>, %arg2: memref<8x128xf32, #tpu.memory_space<vmem>>) attributes {dimension_semantics = [#tpu.dimension_semantics<arbitrary>], iteration_bounds = array<i64: 1>, scalar_prefetch = 0 : i64, scratch_operands = 0 : i64, tpu.core_type = #tpu.core_type<tc>, window_params = [{pipeline_mode = #tpu.pipeline_mode<synchronous>, transform_indices = @transform_0, window_bounds = array<i64: 8, 128>}, {pipeline_mode = #tpu.pipeline_mode<synchronous>, transform_indices = @transform_1, window_bounds = array<i64: 8, 128>}]} {
    %c0 = arith.constant 0 : index
    %c0_0 = arith.constant 0 : index
    %0 = vector.load %arg1[%c0, %c0_0] : memref<8x128xf32, #tpu.memory_space<vmem>>, vector<8x128xf32>
    %c1_i32 = arith.constant 1 : i32
    %1 = tpu.dynamic_rotate %0 by %c1_i32 dim 1 : vector<8x128xf32>, i32 -> vector<8x128xf32>
    %c0_1 = arith.constant 0 : index
    %c0_2 = arith.constant 0 : index
    %2 = vector.load %arg2[%c0_1, %c0_2] : memref<8x128xf32, #tpu.memory_space<vmem>>, vector<8x128xf32>
    tpu.vector_store %arg2[%c0_1, %c0_2], %1 {strides = array<i32>} : memref<8x128xf32, #tpu.memory_space<vmem>>, vector<8x128xf32>,
    return
  }
  func.func @transform_0(%arg0: i32) -> (i32, i32) {
    %c0_i32 = arith.constant 0 : i32
    %c0_i32_0 = arith.constant 0 : i32
    %c0_i32_1 = arith.constant 0 : i32
    return %c0_i32, %c0_i32_0 : i32, i32
  }
  func.func @transform_1(%arg0: i32) -> (i32, i32) {
    %c0_i32 = arith.constant 0 : i32
    %c0_i32_0 = arith.constant 0 : i32
    %c0_i32_1 = arith.constant 0 : i32
    return %c0_i32, %c0_i32_0 : i32, i32
  }
}

</mosaic_0001>

<bundles_post_ra>
// kernel: tpu_custom_call.1
= control target key start
LH: loop header
LB: loop body
LE: loop exit
PB: predicated region body
PF: predicated region fallthrough
CT: control target
= control target key end

     0   :  { %6 = vsyncpa [#allocation3], 0  ;;  %s128_s0 = inlined_call_operand.hbm [shape: f32[8,128], index: 0, kind: input, shape index: {}]   ;;  %s129_s1 = inlined_call_operand.hbm [shape: f32[8,128], index: 1, kind: output, shape index: {}]  }
   0x1   :  { %7 = vsyncpa [#allocation4], 0  ;;  %s91_s6 = smov [#allocation2]   ;;  %s43_s10 = scalar_lea.hbm %s128_s0, 128 }
   0x2   :  { %s14_s7 = sshll.u32 %s91_s6, 4  ;;  %p44_p0 = scmp.ne.s32.totalorder %s128_s0, %s43_s10  ;;  %s15_s7 = int_to_ptr.vmem [resolvable:$true] %s14_s7 }
   0x3   :  { %p47_p1 = scmp.lt.u32.totalorder %s43_s10, %s128_s0 }
   0x5   :  { %p49_p2 = pnand %p47_p1, %p44_p0 }
   0x7   :  { %52 = shalt.err (!%p49_p2)
}
   0x8   :  { %s53_s15 = scalar_lea.vmem %s15_s7, 128  ;;  %p58_p4 = scmp.lt.s32.totalorder %s15_s7, %s15_s7 }
   0x9   :  { %p54_p3 = scmp.ne.s32.totalorder %s15_s7, %s53_s15  ;;  %p59_p5 = scmp.lt.s32.totalorder %s53_s15, %s53_s15 }
   0xb   :  { %p60_p6 = por %p59_p5, %p58_p4 }
   0xd   :  { %p61_p7 = pnand %p60_p6, %p54_p3 }
   0xf   :  { %64 = shalt.err (!%p61_p7)
}
  0x10   :  { %17 = dma.hbm_to_vmem [thread:$0]  %s128_s0, 128, %s15_s7, [#allocation3]  }
  0x11   :  { %87 = dma.done.wait [#allocation3], 128  }
  0x12   :  { %88 = vsyncadd [#allocation3], 4294967168  ;;  %v21_v0 = vld [vmem:[#allocation2] sm:$0xff]  ;;  %s92_s18 = smov 1   ;;  %s93_s19 = smov [#allocation5]  }
  0x13   :  { %22 = vrot.lane.b32.xlu0 %v21_v0, %s92_s18  ;;  %s31_s20 = sshll.u32 %s93_s19, 4  ;;  %s32_s20 = int_to_ptr.vmem [resolvable:$true] %s31_s20 }
  0x14   :  { %s65_s21 = scalar_lea.vmem %s32_s20, 128  ;;  %p70_p9 = scmp.lt.s32.totalorder %s32_s20, %s32_s20 }
  0x15   :  { %p66_p8 = scmp.ne.s32.totalorder %s32_s20, %s65_s21  ;;  %p71_p10 = scmp.lt.s32.totalorder %s65_s21, %s65_s21 }
  0x17   :  { %p72_p11 = por %p71_p10, %p70_p9 }
  0x19   :  { %p73_p12 = pnand %p72_p11, %p66_p8 }
  0x85   :  { %v23_v1 = vpop.permute.xlu0 %22 }
  0x86   :  { %24 = vst [vmem:[#allocation5] sm:$0xff] %v23_v1 }
  0x87   :  { %76 = shalt.err (!%p73_p12)
}
  0x88   :  { %s77_s0 = scalar_lea.hbm %s129_s1, 128 }
  0x89   :  { %p78_p13 = scmp.ne.s32.totalorder %s129_s1, %s77_s0  ;;  %p81_p0 = scmp.lt.u32.totalorder %s77_s0, %s129_s1 }
  0x8b   :  { %p83_p1 = pnand %p81_p0, %p78_p13 }
  0x8d   :  { %86 = shalt.err (!%p83_p1)
}
  0x8e   :  { %34 = dma.vmem_to_hbm [thread:$0]  %s32_s20, 128, %s129_s1, [#allocation4]  }
  0x8f   :  { %89 = dma.done.wait [#allocation4], 128  }
  0x90   :  { %90 = vsyncadd [#allocation4], 4294967168 }
  0x91   :  { %38 = vsyncpa [#allocation3], 1 }
  0x92   :  { %39 = vsyncpa [#allocation4], 1 }

</bundles_post_ra>
